<compile_context>
chip_gen: v7x
topology: tpu7x:2x2x1
jax: 0.10.0
libtpu: 0.0.40
codegen_flags: <defaults>
</compile_context>

<pallas_src>
import jax
import jax.numpy as jnp
from jax import lax
from jax.experimental import pallas as pl
from jax.experimental.pallas import tpu as pltpu


# ----------------------------- kernel -------------------------------------- #

def rope_kernel(x_ref, cos_ref, sin_ref, o_ref):
    """x_ref/o_ref: (Hb, Rt, L).  cos_ref/sin_ref: (Rt, L) in the compute dtype.

    sin_ref holds -sin on even lanes and +sin on odd lanes, so
      out[k] = x[k] * cos[k] + partner[k] * sin[k],
      partner[k] = x[k+1] (even k) / x[k-1] (odd k).
    """
    cos = cos_ref[...]
    sin = sin_ref[...]
    Hb, Rt, L = x_ref.shape

    # Lane-parity mask, built once per grid step (hoisted out of the head loop).
    lane_idx = lax.broadcasted_iota(jnp.int32, (Rt, L), dimension=1)
    take_next = (lane_idx & 1) == 0

    # Per-head loop bounds live intermediates to ~4 * Rt * L elements while the
    # DMA block stays Hb heads wide.  Unroll only when the total unrolled
    # footprint is tiny (so unrolling cannot blow up live ranges / spills).
    unroll = (Hb * Rt * L) <= (64 * 1024)

    def body(h, carry):
        x = x_ref[h].astype(cos.dtype)                    # (Rt, L)
        x_next = pltpu.roll(x, shift=L - 1, axis=1)       # x[(k+1) % L]
        x_prev = pltpu.roll(x, shift=1, axis=1)           # x[(k-1) % L]
        partner = jnp.where(take_next, x_next, x_prev)    # wrap never selected
        o_ref[h] = (x * cos + partner * sin).astype(o_ref.dtype)
        return carry

    lax.fori_loop(0, Hb, body, 0, unroll=unroll)


# --------------------------- table construction ----------------------------- #

def _build_tables(dim, max_seq_len, base):
    """Built once at init (f32).  Returns (S, dim):
       cos_full[t, 2j] = cos_full[t, 2j+1] = cos(t * inv_freq_j)
       sin_comb[t, d]  = -sin(t * inv_freq_{d//2}) if d even else +sin(...)
    """
    inv_freq = 1.0 / (base ** (jnp.arange(0, dim, 2, dtype=jnp.float32) / dim))
    t = jnp.arange(max_seq_len, dtype=jnp.float32)
    freqs = t[:, None] * inv_freq[None, :]                  # (S, dim//2)
    cos_full = jnp.repeat(jnp.cos(freqs), 2, axis=-1)       # (S, dim)
    sin_full = jnp.repeat(jnp.sin(freqs), 2, axis=-1)
    sign = jnp.where((jnp.arange(dim) % 2) == 0, -1.0, 1.0)
    sin_comb = sin_full * sign[None, :]
    return cos_full, sin_comb


# ----------------------------- tiling choice -------------------------------- #

_LANE_CANDIDATES = (2048, 1024, 512, 256, 128)
_TABLE_BLOCK_BUDGET = 512 * 1024      # per-table block bytes (f32 equivalent)
_X_BLOCK_BUDGET = 2 * 1024 * 1024     # x block bytes (x dtype); out block matches


def _choose_layout(num_groups, flat_len, x_itemsize):
    # Lane width: largest multiple-of-128 divisor of T*D that still leaves
    # >= 8 rows (full sublane tiles); else most-rows divisor; else full extent.
    divs = [c for c in _LANE_CANDIDATES if flat_len % c == 0]
    good = [c for c in divs if flat_len // c >= 8]
    if good:
        lane = good[0]
    elif divs:
        lane = divs[-1]
    else:
        lane = flat_len
    rows = flat_len // lane

    # Row tile: multiple of 8 (or the full row extent), table block <= 512 KiB.
    max_rt = max(8, (_TABLE_BLOCK_BUDGET // (lane * 4)) // 8 * 8)
    if rows * lane * 4 <= _TABLE_BLOCK_BUDGET or rows < 8:
        row_tile = rows
    else:
        cap = min(max_rt, rows // 8 * 8)
        row_tile = 0
        for rt in range(cap, 7, -8):          # prefer an exact divisor
            if rows % rt == 0:
                row_tile = rt
                break
        if row_tile == 0:                     # none: allow modest (<=12.5%) padding
            for rt in range(cap, 7, -8):
                if ((-rows) % rt) * 8 <= rows:
                    row_tile = rt
                    break
        if row_tile == 0:
            row_tile = 8
    rows_padded = ((rows + row_tile - 1) // row_tile) * row_tile

    # Heads per block: largest divisor of G keeping the x block <= ~2 MiB.
    heads_blk = 1
    for h in range(num_groups, 0, -1):
        if num_groups % h == 0 and h * row_tile * lane * x_itemsize <= _X_BLOCK_BUDGET:
            heads_blk = h
            break

    # Guarantee >= 2 grid steps when possible so both v7x TensorCores get work.
    if (rows_padded // row_tile) * (num_groups // heads_blk) < 2:
        if num_groups >= 2:
            for h in range(num_groups // 2, 0, -1):
                if num_groups % h == 0:
                    heads_blk = h
                    break
        elif rows_padded >= 16:
            rt = (rows_padded // 2) // 8 * 8
            while rt >= 8 and rows_padded % rt != 0:
                rt -= 8
            if rt >= 8:
                row_tile = rt

    return lane, rows, row_tile, rows_padded, heads_blk


_VMEM_LIMIT = None


def _vmem_limit_bytes():
    """~half of physical VMEM: ~32 MiB on v7x (64 MiB/TC), ~64 MiB on v5e/v6e."""
    global _VMEM_LIMIT
    if _VMEM_LIMIT is None:
        cap = 128 * 1024 * 1024
        try:
            cap = int(pltpu.get_tpu_info().vmem_capacity_bytes)
        except Exception:
            pass
        _VMEM_LIMIT = int(min(64 * 1024 * 1024, max(32 * 1024 * 1024, cap // 2)))
    return _VMEM_LIMIT


# ----------------------------- pallas wrapper -------------------------------- #

def _rope_pallas(x, cos_t, sin_t, donate_x=False):
    B, H, T, D = x.shape
    G = B * H
    flat_len = T * D
    L, R, Rt, R_pad, Hb = _choose_layout(G, flat_len, x.dtype.itemsize)

    # Lane-dense flattening: (G, T, D) -> (G, R, L); tables reshaped the same
    # way so element (t, d) lines up position-wise.  D and L are even, so the
    # lane-index parity inside a row equals the parity of d.
    x_flat = x.reshape(G, R, L)
    cos_r = cos_t[:T].reshape(R, L)
    sin_r = sin_t[:T].reshape(R, L)
    if R_pad != R:
        # Awkward row counts only: pad to keep dense 8x128 tiles (costs one
        # extra copy of x; padded rows are zero and sliced off below).
        x_flat = jnp.pad(x_flat, ((0, 0), (0, R_pad - R), (0, 0)))
        cos_r = jnp.pad(cos_r, ((0, R_pad - R), (0, 0)))
        sin_r = jnp.pad(sin_r, ((0, R_pad - R), (0, 0)))

    # Row-tile axis outermost so the cos/sin blocks stay resident in VMEM
    # across the inner head loop (re-DMA'd only R_pad//Rt times).
    grid = (R_pad // Rt, G // Hb)

    out = pl.pallas_call(
        rope_kernel,
        out_shape=jax.ShapeDtypeStruct((G, R_pad, L), x.dtype),
        grid=grid,
        in_specs=[
            pl.BlockSpec((Hb, Rt, L), lambda r, g: (g, r, 0)),
            pl.BlockSpec((Rt, L), lambda r, g: (r, 0)),
            pl.BlockSpec((Rt, L), lambda r, g: (r, 0)),
        ],
        out_specs=pl.BlockSpec((Hb, Rt, L), lambda r, g: (g, r, 0)),
        compiler_params=pltpu.CompilerParams(
            dimension_semantics=("parallel", "parallel"),
            vmem_limit_bytes=_vmem_limit_bytes(),
        ),
        input_output_aliases=({0: 0} if donate_x else {}),
    )(x_flat, cos_r, sin_r)

    if R_pad != R:
        out = out[:, :R, :]
    return out.reshape(B, H, T, D)


_rope_pallas_jit = jax.jit(_rope_pallas, static_argnames=("donate_x",))


# ----------------------------- module-like API ------------------------------- #

class RoPE:
    """Rotary position embeddings (forward), mirroring the PyTorch module."""

    def __init__(self, dim, max_seq_len=2048, base=10000):
        assert dim % 2 == 0
        self.dim = dim
        self.max_seq_len = max_seq_len
        self.base = base
        # Tables built once here (f32), cached per compute dtype below.
        self._cos_f32, self._sin_f32 = _build_tables(dim, max_seq_len, base)
        self._tables = {}

    def _get_tables(self, compute_dtype):
        key = jnp.dtype(compute_dtype).name
        if key not in self._tables:
            self._tables[key] = (self._cos_f32.astype(compute_dtype),
                                 self._sin_f32.astype(compute_dtype))
        return self._tables[key]

    def __call__(self, x, seq_len=None, donate_x=False):
        B, H, T, D = x.shape
        assert D == self.dim
        if T > self.max_seq_len:  # mirror _extend_cos_sin_cache (not jit-safe)
            self.max_seq_len = T
            self._cos_f32, self._sin_f32 = _build_tables(self.dim, T, self.base)
            self._tables = {}
        # NOTE: like the reference module, `seq_len` does not change the math
        # (cos/sin are always indexed 0..T-1); accepted for API parity only.
        compute_dtype = jnp.bfloat16 if x.dtype == jnp.bfloat16 else jnp.float32
        cos_t, sin_t = self._get_tables(compute_dtype)
        return _rope_pallas_jit(x, cos_t, sin_t, donate_x=donate_x)


# ------------------------------- reference ----------------------------------- #

def rope_reference(x, dim, max_seq_len=2048, base=10000):
    """Pure-JAX reference matching the PyTorch forward exactly (f32 compute)."""
    B, H, T, D = x.shape
    eff_max = max(max_seq_len, T)
    inv_freq = 1.0 / (base ** (jnp.arange(0, dim, 2, dtype=jnp.float32) / dim))
    t = jnp.arange(eff_max, dtype=jnp.float32)
    freqs = t[:, None] * inv_freq[None, :]
    cos = jnp.cos(freqs)[:T][None, None]           # (1, 1, T, D//2)
    sin = jnp.sin(freqs)[:T][None, None]
    xf = x.astype(jnp.float32).reshape(B, H, T, D // 2, 2)
    x1, x2 = xf[..., 0], xf[..., 1]
    rotated = jnp.stack([x1 * cos - x2 * sin, x2 * cos + x1 * sin], axis=-1)
    return rotated.reshape(B, H, T, D)


# --------------------------------- test -------------------------------------- #

if __name__ == "__main__":
    key = jax.random.PRNGKey(0)

    # Primary small-shape test matching the module convention (B, H, T, D).
    B, H, T, D = 2, 4, 8, 32
    x = jax.random.normal(key, (B, H, T, D), dtype=jnp.float32)
    rope = RoPE(dim=D, max_seq_len=2048, base=10000)
    out = jax.block_until_ready(rope(x))
    ref = rope_reference(x, D)
    assert out.shape == (B, H, T, D)
    assert jnp.allclose(out, ref, atol=1e-5, rtol=1e-5), "f32 mismatch vs reference"

    # bf16 I/O with bf16 compute path (reference computed in f32).
    x_bf16 = x.astype(jnp.bfloat16)
    out_bf16 = jax.block_until_ready(rope(x_bf16))
    ref_bf16 = rope_reference(x_bf16, D)
    assert out_bf16.dtype == jnp.bfloat16
    assert jnp.allclose(out_bf16.astype(jnp.float32), ref_bf16,
                        atol=5e-2, rtol=5e-2), "bf16 mismatch vs reference"

    # Larger head_dim / seq to exercise the lane-dense flattened (R, L) path.
    B2, H2, T2, D2 = 1, 2, 128, 64
    x2 = jax.random.normal(jax.random.PRNGKey(1), (B2, H2, T2, D2), dtype=jnp.float32)
    rope2 = RoPE(dim=D2, max_seq_len=256, base=10000)
    out2 = jax.block_until_ready(rope2(x2))
    ref2 = rope_reference(x2, D2, max_seq_len=256)
    assert jnp.allclose(out2, ref2, atol=1e-5, rtol=1e-5), "mismatch on flattened path"

    print("KERNEL_OK")
</pallas_src>

<mosaic_0001>
module attributes {stable_mosaic.version = 11 : i64} {
  func.func @rope_kernel(%arg0: i32, %arg1: i32, %arg2: memref<4x2x128xf32, #tpu.memory_space<vmem>>, %arg3: memref<2x128xf32, #tpu.memory_space<vmem>>, %arg4: memref<2x128xf32, #tpu.memory_space<vmem>>, %arg5: memref<4x2x128xf32, #tpu.memory_space<vmem>>) attributes {dimension_semantics = [#tpu.dimension_semantics<parallel>, #tpu.dimension_semantics<parallel>], iteration_bounds = array<i64: 1, 2>, scalar_prefetch = 0 : i64, scratch_operands = 0 : i64, tpu.core_type = #tpu.core_type<tc>, window_params = [{transform_indices = @transform_0, window_bounds = array<i64: 4, 2, 128>}, {transform_indices = @transform_1, window_bounds = array<i64: 2, 128>}, {transform_indices = @transform_2, window_bounds = array<i64: 2, 128>}, {transform_indices = @transform_3, window_bounds = array<i64: 4, 2, 128>}]} {
    %c0 = arith.constant 0 : index
    %c0_0 = arith.constant 0 : index
    %0 = vector.load %arg3[%c0, %c0_0] : memref<2x128xf32, #tpu.memory_space<vmem>>, vector<2x128xf32>
    %c0_1 = arith.constant 0 : index
    %c0_2 = arith.constant 0 : index
    %1 = vector.load %arg4[%c0_1, %c0_2] : memref<2x128xf32, #tpu.memory_space<vmem>>, vector<2x128xf32>
    %2 = tpu.iota {dimensions = array<i32: 1>} : vector<2x128xi32>
    %c1_i32 = arith.constant 1 : i32
    %3 = vector.broadcast %c1_i32 : i32 to vector<2x128xi32>
    %4 = arith.andi %2, %3 : vector<2x128xi32>
    %c0_i32 = arith.constant 0 : i32
    %5 = vector.broadcast %c0_i32 : i32 to vector<2x128xi32>
    %6 = arith.cmpi eq, %4, %5 : vector<2x128xi32>
    %c0_i32_3 = arith.constant 0 : i32
    %7 = arith.index_cast %c0_i32_3 : i32 to index
    %c0_4 = arith.constant 0 : index
    %c0_5 = arith.constant 0 : index
    %8 = vector.load %arg2[%7, %c0_4, %c0_5] : memref<4x2x128xf32, #tpu.memory_space<vmem>>, vector<1x2x128xf32>
    %9 = vector.shape_cast %8 : vector<1x2x128xf32> to vector<2x128xf32>
    %c127_i32 = arith.constant 127 : i32
    %10 = tpu.dynamic_rotate %9 by %c127_i32 dim 1 : vector<2x128xf32>, i32 -> vector<2x128xf32>
    %c1_i32_6 = arith.constant 1 : i32
    %11 = tpu.dynamic_rotate %9 by %c1_i32_6 dim 1 : vector<2x128xf32>, i32 -> vector<2x128xf32>
    %12 = arith.select %6, %10, %11 : vector<2x128xi1>, vector<2x128xf32>
    %13 = arith.mulf %9, %0 : vector<2x128xf32>
    %14 = arith.mulf %12, %1 : vector<2x128xf32>
    %15 = arith.addf %13, %14 : vector<2x128xf32>
    %16 = arith.index_cast %c0_i32_3 : i32 to index
    %c0_7 = arith.constant 0 : index
    %c0_8 = arith.constant 0 : index
    %17 = vector.load %arg5[%16, %c0_7, %c0_8] : memref<4x2x128xf32, #tpu.memory_space<vmem>>, vector<1x2x128xf32>
    %18 = vector.shape_cast %17 : vector<1x2x128xf32> to vector<2x128xf32>
    %19 = vector.shape_cast %15 : vector<2x128xf32> to vector<1x2x128xf32>
    tpu.vector_store %arg5[%16, %c0_7, %c0_8], %19 {strides = array<i32>} : memref<4x2x128xf32, #tpu.memory_space<vmem>>, vector<1x2x128xf32>,
    %c1_i32_9 = arith.constant 1 : i32
    %20 = arith.index_cast %c1_i32_9 : i32 to index
    %c0_10 = arith.constant 0 : index
    %c0_11 = arith.constant 0 : index
    %21 = vector.load %arg2[%20, %c0_10, %c0_11] : memref<4x2x128xf32, #tpu.memory_space<vmem>>, vector<1x2x128xf32>
    %22 = vector.shape_cast %21 : vector<1x2x128xf32> to vector<2x128xf32>
    %c127_i32_12 = arith.constant 127 : i32
    %23 = tpu.dynamic_rotate %22 by %c127_i32_12 dim 1 : vector<2x128xf32>, i32 -> vector<2x128xf32>
    %c1_i32_13 = arith.constant 1 : i32
    %24 = tpu.dynamic_rotate %22 by %c1_i32_13 dim 1 : vector<2x128xf32>, i32 -> vector<2x128xf32>
    %25 = arith.select %6, %23, %24 : vector<2x128xi1>, vector<2x128xf32>
    %26 = arith.mulf %22, %0 : vector<2x128xf32>
    %27 = arith.mulf %25, %1 : vector<2x128xf32>
    %28 = arith.addf %26, %27 : vector<2x128xf32>
    %29 = arith.index_cast %c1_i32_9 : i32 to index
    %c0_14 = arith.constant 0 : index
    %c0_15 = arith.constant 0 : index
    %30 = vector.load %arg5[%29, %c0_14, %c0_15] : memref<4x2x128xf32, #tpu.memory_space<vmem>>, vector<1x2x128xf32>
    %31 = vector.shape_cast %30 : vector<1x2x128xf32> to vector<2x128xf32>
    %32 = vector.shape_cast %28 : vector<2x128xf32> to vector<1x2x128xf32>
    tpu.vector_store %arg5[%29, %c0_14, %c0_15], %32 {strides = array<i32>} : memref<4x2x128xf32, #tpu.memory_space<vmem>>, vector<1x2x128xf32>,
    %c2_i32 = arith.constant 2 : i32
    %33 = arith.index_cast %c2_i32 : i32 to index
    %c0_16 = arith.constant 0 : index
    %c0_17 = arith.constant 0 : index
    %34 = vector.load %arg2[%33, %c0_16, %c0_17] : memref<4x2x128xf32, #tpu.memory_space<vmem>>, vector<1x2x128xf32>
    %35 = vector.shape_cast %34 : vector<1x2x128xf32> to vector<2x128xf32>
    %c127_i32_18 = arith.constant 127 : i32
    %36 = tpu.dynamic_rotate %35 by %c127_i32_18 dim 1 : vector<2x128xf32>, i32 -> vector<2x128xf32>
    %c1_i32_19 = arith.constant 1 : i32
    %37 = tpu.dynamic_rotate %35 by %c1_i32_19 dim 1 : vector<2x128xf32>, i32 -> vector<2x128xf32>
    %38 = arith.select %6, %36, %37 : vector<2x128xi1>, vector<2x128xf32>
    %39 = arith.mulf %35, %0 : vector<2x128xf32>
    %40 = arith.mulf %38, %1 : vector<2x128xf32>
    %41 = arith.addf %39, %40 : vector<2x128xf32>
    %42 = arith.index_cast %c2_i32 : i32 to index
    %c0_20 = arith.constant 0 : index
    %c0_21 = arith.constant 0 : index
    %43 = vector.load %arg5[%42, %c0_20, %c0_21] : memref<4x2x128xf32, #tpu.memory_space<vmem>>, vector<1x2x128xf32>
    %44 = vector.shape_cast %43 : vector<1x2x128xf32> to vector<2x128xf32>
    %45 = vector.shape_cast %41 : vector<2x128xf32> to vector<1x2x128xf32>
    tpu.vector_store %arg5[%42, %c0_20, %c0_21], %45 {strides = array<i32>} : memref<4x2x128xf32, #tpu.memory_space<vmem>>, vector<1x2x128xf32>,
    %c3_i32 = arith.constant 3 : i32
    %46 = arith.index_cast %c3_i32 : i32 to index
    %c0_22 = arith.constant 0 : index
    %c0_23 = arith.constant 0 : index
    %47 = vector.load %arg2[%46, %c0_22, %c0_23] : memref<4x2x128xf32, #tpu.memory_space<vmem>>, vector<1x2x128xf32>
    %48 = vector.shape_cast %47 : vector<1x2x128xf32> to vector<2x128xf32>
    %c127_i32_24 = arith.constant 127 : i32
    %49 = tpu.dynamic_rotate %48 by %c127_i32_24 dim 1 : vector<2x128xf32>, i32 -> vector<2x128xf32>
    %c1_i32_25 = arith.constant 1 : i32
    %50 = tpu.dynamic_rotate %48 by %c1_i32_25 dim 1 : vector<2x128xf32>, i32 -> vector<2x128xf32>
    %51 = arith.select %6, %49, %50 : vector<2x128xi1>, vector<2x128xf32>
    %52 = arith.mulf %48, %0 : vector<2x128xf32>
    %53 = arith.mulf %51, %1 : vector<2x128xf32>
    %54 = arith.addf %52, %53 : vector<2x128xf32>
    %55 = arith.index_cast %c3_i32 : i32 to index
    %c0_26 = arith.constant 0 : index
    %c0_27 = arith.constant 0 : index
    %56 = vector.load %arg5[%55, %c0_26, %c0_27] : memref<4x2x128xf32, #tpu.memory_space<vmem>>, vector<1x2x128xf32>
    %57 = vector.shape_cast %56 : vector<1x2x128xf32> to vector<2x128xf32>
    %58 = vector.shape_cast %54 : vector<2x128xf32> to vector<1x2x128xf32>
    tpu.vector_store %arg5[%55, %c0_26, %c0_27], %58 {strides = array<i32>} : memref<4x2x128xf32, #tpu.memory_space<vmem>>, vector<1x2x128xf32>,
    %c4_i32 = arith.constant 4 : i32
    return
  }
  func.func @transform_0(%arg0: i32, %arg1: i32) -> (i32, i32, i32) {
    %c0_i32 = arith.constant 0 : i32
    %c0_i32_0 = arith.constant 0 : i32
    return %arg1, %arg0, %c0_i32 : i32, i32, i32
  }
  func.func @transform_1(%arg0: i32, %arg1: i32) -> (i32, i32) {
    %c0_i32 = arith.constant 0 : i32
    %c0_i32_0 = arith.constant 0 : i32
    return %arg0, %c0_i32 : i32, i32
  }
  func.func @transform_2(%arg0: i32, %arg1: i32) -> (i32, i32) {
    %c0_i32 = arith.constant 0 : i32
    %c0_i32_0 = arith.constant 0 : i32
    return %arg0, %c0_i32 : i32, i32
  }
  func.func @transform_3(%arg0: i32, %arg1: i32) -> (i32, i32, i32) {
    %c0_i32 = arith.constant 0 : i32
    %c0_i32_0 = arith.constant 0 : i32
    return %arg1, %arg0, %c0_i32 : i32, i32, i32
  }
}

</mosaic_0001>

<bundles_post_ra>
// kernel: _rope_pallas.1
= control target key start
LH: loop header
LB: loop body
LE: loop exit
PB: predicated region body
PF: predicated region fallthrough
CT: control target
= control target key end

     0   :  { %8 = vsyncpa [#allocation3], 0  ;;  %s1006_s0 = inlined_call_operand.hbm [shape: f32[8,2,128], index: 0, kind: input, shape index: {}]   ;;  %s1007_s1 = inlined_call_operand.hbm [shape: f32[2,128], index: 1, kind: input, shape index: {}]   ;;  %s1008_s2 = inlined_call_operand.hbm [shape: f32[2,128], index: 2, kind: input, shape index: {}]   ;;  %s1009_s3 = inlined_call_operand.hbm [shape: f32[8,2,128], index: 3, kind: output, shape index: {}]  }
   0x1   :  { %10 = vsyncpa [#allocation3 + $0x1], 0 }
   0x2   :  { %11 = vsyncpa [#allocation6], 0 }
   0x3   :  { %12 = vsyncpa [#allocation4], 0 }
   0x4   :  { %14 = vsyncpa [#allocation4 + $0x1], 0  ;;  %s742_s12 = smov 0   ;;  %s744_s13 = smov 0  }
   0x5   :  { %s746_s14 = smov 0   ;;  %s748_s15 = smov 0  }
   0x6   :  { %s750_s16 = smov 0   ;;  %s752_s17 = smov 0  }
   0x7 LB: > { %s422_s18 = sadd.s32 4294967295, %s710_s17   ;;  %s423_s19 = sadd.s32 4294967294, %s710_s17   ;;  %s710_s17 = sphi %s752_s17, %s20_s17   ;;  %s706_s16 = sphi %s750_s16, %s1037_s16   ;;  %s702_s15 = sphi %s748_s15, %s1036_s15   ;;  %s698_s14 = sphi %s746_s14, %s1035_s14   ;;  %s694_s13 = sphi %s744_s13, %s1034_s13   ;;  %s690_s12 = sphi %s742_s12, %s1033_s12  }
   0x8   : > { %s41_s20 = sadd.s32 1, %s698_s14  ;;  %p48_p0 = scmp.ne.s32.totalorder %s698_s14, %s694_s13 }
   0x9   : > { %p49_p1 = scmp.eq.s32.totalorder %s710_s17, 0  ;;  %p54_p2 = scmp.ne.s32.totalorder %s694_s13, %s690_s12 }
   0xa   : > { %p780_p3 = scmp.eq.s32.totalorder %s422_s18, 0  ;;  %p132_p4 = scmp.eq.s32.totalorder %s422_s18, 1 }
   0xb   : > { %p784_p5 = por %p49_p1, %p48_p0  ;;  %p138_p6 = scmp.eq.s32.totalorder %s423_s19, 1 }
   0xc   : > { %s1016_s21 = scalar_select %p780_p3, 1, 0 }
   0xd   : > { %p790_p7 = por %p780_p3, %p54_p2  ;;  %p794_p8 = por %p132_p4, %p48_p0 }
   0xe   : > { %p798_p9 = por %p138_p6, %p54_p2  ;;  %p424_p10 = scmp.ge.s32.totalorder %s710_s17, 1 }
   0xf   : > { %s1018_s23 = scalar_select %p790_p7, 1, 0 }
  0x10   : > { %s1019_s24 = scalar_select %p794_p8, 1, 0 }
  0x11   : > { %s1020_s25 = scalar_select %p798_p9, 1, 0 }
  0x12   : > { %p145_p11 = scmp.lt.s32.totalorder %s710_s17, 3  ;;  %s712_s27 = smov [#allocation5]  }
  0x13   : > { %s160_s28 = sshll.u32 %s712_s27, 4  ;;  %p478_p1 = scmp.lt.s32.totalorder %s710_s17, 2  ;;  %s161_s28 = int_to_ptr.vmem [resolvable:$true] %s160_s28 }
  0x14   : > { %p805_p13 = pnand %p424_p10, %p145_p11  ;;  %s713_s30 = smov [#allocation7]  }
  0x15   : > { %p814_p4 = pnand %p478_p1, %p784_p5  ;;  %s173_s4 = sshll.u32 %s713_s30, 4  ;;  %s824_s4 = int_to_ptr.vmem [resolvable:$true] %s173_s4 }
  0x16   : > { %s1021_s26 = scalar_select %p805_p13, 1, 0 }
  0x17   : > { %p461_p0 = pneg %p805_p13  ;;  %s538_s8 = scalar_lea.hbm %s1007_s1, 32 }
  0x18   : > { %s1022_s29 = scalar_select %p814_p4, 1, 0 }
  0x19   : > { %p820_p2 = pnand %p461_p0, %p780_p3  ;;  %p539_p5 = scmp.ne.s32.totalorder %s1007_s1, %s538_s8 }
  0x1a   : > { %p545_p1 = scmp.lt.u32.totalorder %s538_s8, %s1007_s1 }
  0x1b   : > { %p540_p6 = pneg %p820_p2 }
  0x1d   : > { %p541_p10 = pnand %p540_p6, %p539_p5 }
  0x1f   : > { %p542_p11 = pneg %p541_p10 }
  0x21   : > { %p547_p0 = pnand %p545_p1, %p542_p11 }
  0x23   : > { %550 = shalt.err (!%p547_p0)
}
  0x24   : > { %s551_s19 = scalar_lea.vmem %s161_s28, 32  ;;  %p559_p3 = scmp.lt.s32.totalorder %s161_s28, %s161_s28 }
  0x25   : > { %p552_p12 = scmp.ne.s32.totalorder %s161_s28, %s551_s19  ;;  %p560_p7 = scmp.lt.s32.totalorder %s551_s19, %s551_s19 }
  0x27   : > { %p554_p9 = pnand %p552_p12, %p540_p6  ;;  %p561_p13 = por %p560_p7, %p559_p3 }
  0x29   : > { %p555_p8 = pneg %p554_p9 }
  0x2b   : > { %p562_p4 = pnand %p561_p13, %p555_p8 }
  0x2d   : > { %565 = shalt.err (!%p562_p4)
}
  0x2e   : > { %464 = dma.hbm_to_vmem [thread:$0]  (!%p820_p2), %s1007_s1, 32, %s161_s28, [#allocation6]  }
  0x2f   : > { %s566_s7 = scalar_lea.hbm %s1008_s2, 32 }
  0x30   : > { %p567_p9 = scmp.ne.s32.totalorder %s1008_s2, %s566_s7  ;;  %p573_p8 = scmp.lt.u32.totalorder %s566_s7, %s1008_s2 }
  0x32   : > { %p569_p3 = pnand %p567_p9, %p540_p6 }
  0x34   : > { %p570_p7 = pneg %p569_p3 }
  0x36   : > { %p575_p12 = pnand %p573_p8, %p570_p7 }
  0x38   : > { %578 = shalt.err (!%p575_p12)
}
  0x39   : > { %s579_s28 = scalar_lea.vmem %s824_s4, 32  ;;  %p587_p10 = scmp.lt.s32.totalorder %s824_s4, %s824_s4 }
  0x3a   : > { %p580_p13 = scmp.ne.s32.totalorder %s824_s4, %s579_s28  ;;  %p588_p11 = scmp.lt.s32.totalorder %s579_s28, %s579_s28 }
  0x3c   : > { %p582_p4 = pnand %p580_p13, %p540_p6  ;;  %p589_p1 = por %p588_p11, %p587_p10 }
  0x3e   : > { %p583_p5 = pneg %p582_p4 }
  0x40   : > { %p590_p0 = pnand %p589_p1, %p583_p5 }
  0x42   : > { %593 = shalt.err (!%p590_p0)
}
  0x43   : > { %467 = dma.hbm_to_vmem [thread:$0]  (!%p820_p2), %s1008_s2, 32, %s824_s4, [#allocation6]  }
  0x44   : > { %s29_s22 = sadd.s32 1, %s706_s16  ;;  %s184_s27 = sand.u32 1, %s698_s14  }
  0x45   : > { %p30_p6 = scmp.ge.s32.totalorder %s29_s22, 2  ;;  %s428_s30 = sshll.u32 %s184_s27, 3 }
  0x46   : > { %s447_s6 = sshll.u32 %s706_s16, 7  ;;  %s188_s4 = scalar_lea.vmem [#allocation2], %s428_s30 }
  0x47   : > { %s1039_s22 = smov (%p30_p6, %s29_s22), 0  ;;  %s881_s8 = scalar_lea.hbm %s1006_s0, %s447_s6 }
  0x48   : > { %s36_s9 = ssub.s32 %s706_s16, %s1039_s22  ;;  %s196_s10 = sshll.u32 %s188_s4, 4  ;;  %s885_s10 = int_to_ptr.vmem [resolvable:$true] %s196_s10 }
  0x49   : > { %p39_p2 = scmp.eq.s32.totalorder %s36_s9, 0  ;;  %s892_s28 = scalar_lea.sflag [#allocation3], %s184_s27 }
  0x4a   : > { %s594_s18 = scalar_lea.hbm %s881_s8, 128  ;;  %p1024_p3 = scmp.ne.s32.totalorder %s1022_s29, 0 }
  0x4b   : > { %s890_s11 = scalar_select %p39_p2, %s698_s14, %s41_s20  }
  0x4c   : > { %p595_p9 = scmp.ne.s32.totalorder %s881_s8, %s594_s18  ;;  %p596_p7 = pneg %p1024_p3 }
  0x4d   : > { %s599_s30 = scalar_lea.hbm %s1006_s0, 256  ;;  %p600_p13 = scmp.lt.u32.totalorder %s881_s8, %s1006_s0 }
  0x4e   : > { %p597_p8 = pnand %p596_p7, %p595_p9  ;;  %p601_p4 = scmp.lt.u32.totalorder %s599_s30, %s594_s18 }
  0x4f   : > { %p603_p10 = scmp.lt.u32.totalorder %s594_s18, %s881_s8 }
  0x50   : > { %p598_p12 = pneg %p597_p8  ;;  %p602_p5 = por %p601_p4, %p600_p13 }
  0x52   : > { %p604_p11 = por %p603_p10, %p602_p5 }
  0x54   : > { %p605_p1 = pnand %p604_p11, %p598_p12 }
  0x56   : > { %608 = shalt.err (!%p605_p1)
}
  0x57   : > { %s609_s20 = scalar_lea.vmem %s885_s10, 128  ;;  %s714_s27 = smov [#allocation2]  }
  0x58   : > { %p610_p0 = scmp.ne.s32.totalorder %s885_s10, %s609_s20  ;;  %s614_s9 = sshll.u32 %s714_s27, 4  ;;  %s615_s9 = int_to_ptr.vmem [resolvable:$false] %s614_s9 }
  0x59   : > { %s616_s4 = scalar_lea.vmem %s615_s9, 256  ;;  %p617_p9 = scmp.lt.s32.totalorder %s885_s10, %s615_s9 }
  0x5a   : > { %p612_p6 = pnand %p610_p0, %p596_p7  ;;  %p618_p8 = scmp.lt.s32.totalorder %s616_s4, %s609_s20 }
  0x5c   : > { %p613_p2 = pneg %p612_p6  ;;  %p619_p13 = por %p618_p8, %p617_p9 }
  0x5e   : > { %p620_p4 = pnand %p619_p13, %p613_p2 }
  0x60   : > { %623 = shalt.err (!%p620_p4)
}
  0x61   : > { %s715_s18 = smov 32   ;;  %s716_s19 = smov 2  }
  0x62   : > { %471 = dma.hbm_to_vmem [thread:$0]  (!%p1024_p3), %s881_s8, 128, %s885_s10, %s892_s28, %s715_s18, %s715_s18, %s716_s19  }
  0x63   : > { %p1025_p7 = scmp.ne.s32.totalorder %s1021_s26, 0 }
  0x64   : > { %s923_s6 = sand.u32 (!%p1025_p7), 1, %s694_s13   ;;  %p1026_p12 = scmp.ne.s32.totalorder (!%p1025_p7), %s1018_s23, 0 }
  0x65   : > { %208 = sbr.rel (%p1025_p7) target bundleno = 261 (0x105), region = 32  ;;  %s432_s30 = sshll.u32 (!%p1025_p7), %s923_s6, 3 }
  0x66   : > { %s211_s5 = scalar_lea.sflag (!%p1025_p7), [#allocation3], %s923_s6  ;;  %s214_s7 = scalar_lea.vmem (!%p1025_p7), [#allocation2], %s432_s30 }
  0x6c   : > { %677 = dma.done.wait (%p1026_p12), %s211_s5, 128  }
  0x6d   : > { %679 = vsyncadd (%p1026_p12), %s211_s5, 4294967168  ;;  %p1027_p3 = scmp.ne.s32.totalorder %s1016_s21, 0 }
  0x6f   : > { %681 = dma.done.wait (%p1027_p3), [#allocation6], 64  }
  0x70   : > { %683 = vsyncadd (%p1027_p3), [#allocation6], 4294967232  ;;  %v436_v0 = vld [vmem:[%s214_s7 + $0x2] sm:$0x3]  ;;  %v253_v1 = vld [vmem:[%s214_s7] sm:$0x3]  ;;  %v249_v4 = vlaneseq }
  0x71   : > { %s717_s26 = smov 127   ;;  %s718_s29 = smov 1   ;;  %v438_v2 = vld [vmem:[%s214_s7 + $0x4] sm:$0x3]  ;;  %v440_v3 = vld [vmem:[%s214_s7 + $0x6] sm:$0x3] }
  0x72   : > { %265 = vrot.lane.b32.xlu1 %v436_v0, %s717_s26  ;;  %254 = vrot.lane.b32.xlu0 %v253_v1, %s717_s26  ;;  %v250_v5 = vand.u32 127, %v249_v4  ;;  %v247_v9 = vld [vmem:[#allocation5] sm:$0x3]  ;;  %v248_v11 = vld [vmem:[#allocation7] sm:$0x3]  ;;  %s244_s21 = scalar_lea.vmem [#allocation8], %s432_s30 }
  0x73   : > { %v270_v12 = vmul.f32 %v436_v0, %v247_v9  ;;  %v259_v13 = vmul.f32 %v253_v1, %v247_v9  ;;  %v282_v20 = vmul.f32 %v438_v2, %v247_v9  ;;  %s314_s23 = sshll.u32 %s244_s21, 4  ;;  %v294_v27 = vmul.f32 %v440_v3, %v247_v9  ;;  %s448_s8 = sshll.u32 %s702_s15, 7  ;;  %s952_s23 = int_to_ptr.vmem [resolvable:$true] %s314_s23 }
  0x74   : > { %v251_v6 = vand.u32 1, %v250_v5  ;;  %s957_s20 = scalar_lea.hbm %s1009_s3, %s448_s8  ;;  %s300_s27 = scalar_lea.sflag [#allocation4], %s923_s6 }
  0x75   : > { %s624_s9 = scalar_lea.vmem %s952_s23, 128  ;;  %p1030_p10 = scmp.ne.s32.totalorder %s1019_s24, 0 }
  0x76   : > { %267 = vrot.lane.b32.xlu1 %v436_v0, %s718_s29  ;;  %256 = vrot.lane.b32.xlu0 %v253_v1, %s718_s29  ;;  %vm937_vm0 = vcmp.eq.s32.totalorder %v251_v6, 0  ;;  %p625_p5 = scmp.ne.s32.totalorder %s952_s23, %s624_s9  ;;  %s719_s15 = smov [#allocation8]  }
  0x77   : > { %s628_s4 = sshll.u32 %s719_s15, 4  ;;  %s629_s4 = int_to_ptr.vmem [resolvable:$false] %s628_s4 }
  0x78   : > { %p626_p11 = pnand %p625_p5, %p1030_p10  ;;  %s630_s18 = scalar_lea.vmem %s629_s4, 256 }
  0x79   : > { %p631_p0 = scmp.lt.s32.totalorder %s952_s23, %s629_s4  ;;  %p632_p6 = scmp.lt.s32.totalorder %s630_s18, %s624_s9 }
  0x7a   : > { %279 = vrot.lane.b32.xlu1 %v438_v2, %s718_s29  ;;  %277 = vrot.lane.b32.xlu0 %v438_v2, %s717_s26  ;;  %p627_p1 = pneg %p626_p11 }
  0x7b   : > { %p633_p2 = por %p632_p6, %p631_p0 }
  0x7d   : > { %p634_p9 = pnand %p633_p2, %p627_p1 }
  0x7e   : > { %291 = vrot.lane.b32.xlu1 %v440_v3, %s718_s29  ;;  %289 = vrot.lane.b32.xlu0 %v440_v3, %s717_s26 }
  0xe4   : > { %v266_v7 = vpop.permute.xlu1 %265  ;;  %v255_v8 = vpop.permute.xlu0 %254 }
  0xe8   : > { %v268_v14 = vpop.permute.xlu1 %267  ;;  %v257_v15 = vpop.permute.xlu0 %256 }
  0xe9   : > { %v269_v16 = vsel %vm937_vm0, %v266_v7, %v268_v14  ;;  %v258_v17 = vsel %vm937_vm0, %v255_v8, %v257_v15 }
  0xea   : > { %v271_v18 = vmul.f32 %v269_v16, %v248_v11  ;;  %v260_v19 = vmul.f32 %v258_v17, %v248_v11 }
  0xec   : > { %v272_v21 = vadd.f32 %v271_v18, %v270_v12  ;;  %v261_v22 = vadd.f32 %v260_v19, %v259_v13  ;;  %v280_v23 = vpop.permute.xlu1 %279  ;;  %v278_v24 = vpop.permute.xlu0 %277 }
  0xed   : > { %v281_v25 = vsel %vm937_vm0, %v278_v24, %v280_v23 }
  0xee   : > { %437 = vst [vmem:[%s244_s21 + $0x2] sm:$0x3] %v272_v21  ;;  %262 = vst [vmem:[%s244_s21] sm:$0x3] %v261_v22  ;;  %v283_v26 = vmul.f32 %v281_v25, %v248_v11 }
  0xf0   : > { %v284_v28 = vadd.f32 %v283_v26, %v282_v20  ;;  %v292_v29 = vpop.permute.xlu1 %291  ;;  %v290_v30 = vpop.permute.xlu0 %289 }
  0xf1   : > { %v293_v31 = vsel %vm937_vm0, %v290_v30, %v292_v29 }
  0xf2   : > { %439 = vst [vmem:[%s244_s21 + $0x4] sm:$0x3] %v284_v28  ;;  %v295_v32 = vmul.f32 %v293_v31, %v248_v11 }
  0xf4   : > { %v296_v33 = vadd.f32 %v295_v32, %v294_v27 }
  0xf6   : > { %441 = vst [vmem:[%s244_s21 + $0x6] sm:$0x3] %v296_v33 }
  0xf7   : > { %637 = shalt.err (!%p634_p9)
}
  0xf8   : > { %s638_s19 = scalar_lea.hbm %s957_s20, 128  ;;  %s642_s7 = scalar_lea.hbm %s1009_s3, 256 }
  0xf9   : > { %p639_p8 = scmp.ne.s32.totalorder %s957_s20, %s638_s19  ;;  %p643_p7 = scmp.lt.u32.totalorder %s957_s20, %s1009_s3 }
  0xfa   : > { %p644_p12 = scmp.lt.u32.totalorder %s642_s7, %s638_s19  ;;  %p646_p5 = scmp.lt.u32.totalorder %s638_s19, %s957_s20 }
  0xfb   : > { %p640_p13 = pnand %p639_p8, %p1030_p10 }
  0xfc   : > { %p645_p3 = por %p644_p12, %p643_p7 }
  0xfd   : > { %p641_p4 = pneg %p640_p13 }
  0xfe   : > { %p647_p11 = por %p646_p5, %p645_p3 }
 0x100   : > { %p648_p1 = pnand %p647_p11, %p641_p4 }
 0x102   : > { %651 = shalt.err (!%p648_p1)
}
 0x103   : > { %s720_s21 = smov 32   ;;  %s721_s8 = smov 2  }
 0x104   : > { %459 = dma.vmem_to_hbm [thread:$0]  (%p1030_p10), %s952_s23, 128, %s957_s20, %s300_s27, %s720_s21, %s720_s21, %s721_s8  }
 0x105 PF: > { %s329_s10 = sand.u32 1, %s690_s12   ;;  %p1031_p0 = scmp.ne.s32.totalorder %s1020_s25, 0 }
 0x106   : > { %p1032_p6 = scmp.ge.s32.totalorder %s710_s17, 2  ;;  %s330_s28 = scalar_lea.sflag [#allocation4], %s329_s10 }
 0x108   : > { %p473_p2 = pnand %p1032_p6, %p1031_p0 }
 0x10a   : > { %685 = dma.done.wait (!%p473_p2), %s330_s28, 128  }
 0x10b   : > { %687 = vsyncadd (!%p473_p2), %s330_s28, 4294967168  ;;  %s20_s17 = sadd.s32 1, %s710_s17   ;;  %s1033_s12 = smov %s694_s13 }
 0x10c   : > { %p17_p9 = scmp.ge.s32.totalorder %s20_s17, 4   ;;  %s1034_s13 = smov %s698_s14 }
 0x10d   : > { %s1035_s14 = smov %s890_s11  ;;  %s1036_s15 = smov %s706_s16 }
 0x10e   : > { %s1037_s16 = smov %s1039_s22  ;;  %19 = sbr.rel (!%p17_p9) target bundleno = 7 (0x7), region = 93 }
 0x115   :  { %335 = vsyncpa [#allocation3], 1 }
 0x116   :  { %337 = vsyncpa [#allocation3 + $0x1], 1 }
 0x117   :  { %338 = vsyncpa [#allocation6], 1 }
 0x118   :  { %339 = vsyncpa [#allocation4], 1 }
 0x119   :  { %341 = vsyncpa [#allocation4 + $0x1], 1 }

</bundles_post_ra>
